<compile_context>
chip_gen: v7x
topology: tpu7x:2x2x1
jax: 0.10.0
libtpu: 0.0.40
codegen_flags: <defaults>
</compile_context>

<pallas_src>
import jax
import jax.numpy as jnp
import numpy as np
from jax.experimental import pallas as pl
from jax.experimental.pallas import tpu as pltpu


def subgcon_kernel(alpha_ref, a_ref, x_ref, w_ref, b_ref, sel_ref,
                   emb_ref, pooled_ref):
    # a_ref:   (gb, n_g, n_g)   bf16   per-subgraph normalized adjacency blocks
    # x_ref:   (gb, n_g, in_dim) bf16  per-subgraph node features
    # w_ref:   (in_dim, emb_pad) bf16  GCN weight (zero-padded to lane width)
    # b_ref:   (1, emb_pad)      f32   GCN bias   (zero-padded)
    # sel_ref: (gb, n_g, 1)      f32   one-hot local center-node selector
    a = a_ref[...]
    x = x_ref[...]

    # Reassociated GCN: A @ (X W + b) = (A @ X) @ W + rowsum(A) * b.
    # Contract over n_g first (in_dim < emb_dim => fewer MXU FLOPs, narrower
    # intermediate).  bf16 MXU inputs, f32 accumulation.
    ax = jnp.einsum('gij,gjk->gik', a, x,
                    preferred_element_type=jnp.float32)
    h = jnp.einsum('gni,id->gnd', ax.astype(jnp.bfloat16), w_ref[...],
                   preferred_element_type=jnp.float32)
    rowsum_a = jnp.sum(a.astype(jnp.float32), axis=-1, keepdims=True)  # XLU
    h = h + rowsum_a * b_ref[...]

    # PReLU in f32 (keep elementwise off bf16 for v5e's VPU).
    alpha = alpha_ref[0]
    h = jnp.where(h > 0, h, alpha * h)

    # Center-node gather (one-hot weighted sum) and AvgPooling as sublane
    # reductions on the XLU -- no dense [B, N] matmuls.
    emb_ref[...] = jnp.sum(sel_ref[...] * h, axis=1)
    pooled_ref[...] = jnp.mean(h, axis=1)


def subg_con_forward(a_blocks, x_blocks, w, b, alpha, sel_local):
    """Forward of SUBG_CON on a batch of equal-size subgraphs.

    a_blocks:  [B, n_g, n_g]  GCN-normalized adjacency block per subgraph
    x_blocks:  [B, n_g, in_dim] node features per subgraph
    w:         [in_dim, emb_dim] GCN weight
    b:         [emb_dim] GCN bias
    alpha:     scalar PReLU slope
    sel_local: [B, n_g] one-hot local index of the center node of each subgraph

    Returns (emb [B, emb_dim], pooled_emb [B, emb_dim]).
    """
    B, n_g, _ = a_blocks.shape
    in_dim = x_blocks.shape[-1]
    emb_dim = w.shape[-1]
    emb_pad = pl.cdiv(emb_dim, 128) * 128          # lane-dense output width
    gb = 8 if (B % 8 == 0) else B                  # subgraphs per grid step
    grid = (B // gb,)

    a_bf = a_blocks.astype(jnp.bfloat16)
    x_bf = x_blocks.astype(jnp.bfloat16)
    w_p = jnp.zeros((in_dim, emb_pad), jnp.bfloat16).at[:, :emb_dim].set(
        w.astype(jnp.bfloat16))
    b_p = jnp.zeros((1, emb_pad), jnp.float32).at[:, :emb_dim].set(
        jnp.reshape(b, (1, emb_dim)).astype(jnp.float32))
    alpha_s = jnp.reshape(jnp.asarray(alpha, jnp.float32), (1,))
    sel = sel_local.astype(jnp.float32).reshape(B, n_g, 1)

    emb_p, pooled_p = pl.pallas_call(
        subgcon_kernel,
        out_shape=(jax.ShapeDtypeStruct((B, emb_pad), jnp.float32),
                   jax.ShapeDtypeStruct((B, emb_pad), jnp.float32)),
        grid_spec=pltpu.PrefetchScalarGridSpec(
            num_scalar_prefetch=0,
            grid=grid,
            in_specs=[
                # PReLU alpha: scalar path, whole (1,) array in SMEM.
                pl.BlockSpec(memory_space=pltpu.MemorySpace.SMEM),
                pl.BlockSpec((gb, n_g, n_g), lambda i: (i, 0, 0)),     # A blocks
                pl.BlockSpec((gb, n_g, in_dim), lambda i: (i, 0, 0)),  # X blocks
                pl.BlockSpec((in_dim, emb_pad), lambda i: (0, 0)),     # W (padded)
                pl.BlockSpec((1, emb_pad), lambda i: (0, 0)),          # bias
                pl.BlockSpec((gb, n_g, 1), lambda i: (i, 0, 0)),       # center one-hot
            ],
            out_specs=(pl.BlockSpec((gb, emb_pad), lambda i: (i, 0)),
                       pl.BlockSpec((gb, emb_pad), lambda i: (i, 0))),
        ),
        compiler_params=pltpu.CompilerParams(
            dimension_semantics=("parallel",),     # megacore-shard subgraph tiles
            vmem_limit_bytes=32 * 1024 * 1024,
        ),
    )(alpha_s, a_bf, x_bf, w_p, b_p, sel)

    return emb_p[:, :emb_dim], pooled_p[:, :emb_dim]


if __name__ == "__main__":
    # Small synthetic "subgraph batch": 16 subgraphs of 8 nodes each.
    key = jax.random.PRNGKey(0)
    B, n_g = 16, 8
    in_dim, emb_dim = 16, 32

    k_x, k_w, k_a = jax.random.split(key, 3)
    x_blocks = jax.random.normal(k_x, (B, n_g, in_dim), jnp.float32)
    # Deterministic GCN parameters (PyTorch PReLU default alpha=0.25).
    w = (jax.random.normal(k_w, (in_dim, emb_dim), jnp.float32) * 0.1
         ).astype(jnp.float32)
    b = jnp.zeros((emb_dim,), jnp.float32)
    alpha = 0.25

    # Per-subgraph symmetric adjacency with self-loops, GCN-normalized.
    bits = np.array(jax.random.bernoulli(k_a, 0.3, (B, n_g, n_g))
                    ).astype(np.float32)
    a_blocks_np = np.zeros((B, n_g, n_g), np.float32)
    for g in range(B):
        blk = np.triu(bits[g], 1)
        blk = blk + blk.T
        np.fill_diagonal(blk, 1.0)                     # self-loops (A + I)
        d_inv_sqrt = 1.0 / np.sqrt(blk.sum(axis=1))
        a_blocks_np[g] = blk * d_inv_sqrt[:, None] * d_inv_sqrt[None, :]
    a_blocks = jnp.asarray(a_blocks_np)

    # Center node of each subgraph = local node 0, as a one-hot selector.
    sel_np = np.zeros((B, n_g), np.float32)
    sel_np[:, 0] = 1.0
    sel_local = jnp.asarray(sel_np)

    emb, pooled_emb = subg_con_forward(a_blocks, x_blocks, w, b, alpha,
                                       sel_local)
    emb, pooled_emb = jax.block_until_ready((emb, pooled_emb))

    # Pure-JAX f32 reference (original association A @ (XW + b)).
    xw_ref = jnp.einsum('gni,id->gnd', x_blocks, w) + b
    h_ref = jnp.einsum('gij,gjd->gid', a_blocks, xw_ref)
    h_ref = jnp.where(h_ref > 0, h_ref, 0.25 * h_ref)
    ref_emb = h_ref[:, 0, :]                 # center = local node 0
    ref_pooled = h_ref.mean(axis=1)

    # bf16 MXU inputs -> loose tolerance vs the f32 reference.
    assert np.allclose(np.array(emb), np.array(ref_emb),
                       atol=5e-2, rtol=5e-2)
    assert np.allclose(np.array(pooled_emb), np.array(ref_pooled),
                       atol=5e-2, rtol=5e-2)

    print("KERNEL_OK")
</pallas_src>

<mosaic_0001>
module attributes {stable_mosaic.version = 11 : i64} {
  func.func @subgcon_kernel(%arg0: i32, %arg1: memref<1xf32, #tpu.memory_space<smem>>, %arg2: memref<8x8x8xbf16, #tpu.memory_space<vmem>>, %arg3: memref<8x8x16xbf16, #tpu.memory_space<vmem>>, %arg4: memref<16x128xbf16, #tpu.memory_space<vmem>>, %arg5: memref<1x128xf32, #tpu.memory_space<vmem>>, %arg6: memref<8x8x1xf32, #tpu.memory_space<vmem>>, %arg7: memref<8x128xf32, #tpu.memory_space<vmem>>, %arg8: memref<8x128xf32, #tpu.memory_space<vmem>>) attributes {dimension_semantics = [#tpu.dimension_semantics<parallel>], iteration_bounds = array<i64: 2>, scalar_prefetch = 0 : i64, scratch_operands = 0 : i64, tpu.core_type = #tpu.core_type<tc>, window_params = [{transform_indices = @transform_0, window_bounds = array<i64: 1>}, {transform_indices = @transform_1, window_bounds = array<i64: 8, 8, 8>}, {transform_indices = @transform_2, window_bounds = array<i64: 8, 8, 16>}, {pipeline_mode = #tpu.pipeline_mode<synchronous>, transform_indices = @transform_3, window_bounds = array<i64: 16, 128>}, {pipeline_mode = #tpu.pipeline_mode<synchronous>, transform_indices = @transform_4, window_bounds = array<i64: 1, 128>}, {transform_indices = @transform_5, window_bounds = array<i64: 8, 8, 1>}, {transform_indices = @transform_6, window_bounds = array<i64: 8, 128>}, {transform_indices = @transform_7, window_bounds = array<i64: 8, 128>}]} {
    %c0 = arith.constant 0 : index
    %c0_0 = arith.constant 0 : index
    %c0_1 = arith.constant 0 : index
    %0 = vector.load %arg2[%c0, %c0_0, %c0_1] : memref<8x8x8xbf16, #tpu.memory_space<vmem>>, vector<8x8x8xbf16>
    %c0_2 = arith.constant 0 : index
    %c0_3 = arith.constant 0 : index
    %c0_4 = arith.constant 0 : index
    %1 = vector.load %arg3[%c0_2, %c0_3, %c0_4] : memref<8x8x16xbf16, #tpu.memory_space<vmem>>, vector<8x8x16xbf16>
    "tpu.trace_start"() <{level = 10 : i32, message = "gij,gjk->gik"}> : () -> ()
    %cst = arith.constant dense<0.000000e+00> : vector<8x8x16xf32>
    %2 = tpu.matmul %0, %1, %cst {dimension_numbers = #tpu.dot_dimension_numbers<[2], [1], [1], [2], [0, 0, 0, 1, 1, 2], [0], [0]>} : vector<8x8x8xbf16>, vector<8x8x16xbf16>, vector<8x8x16xf32> -> vector<8x8x16xf32>
    "tpu.trace_stop"() : () -> ()
    %3 = arith.truncf %2 : vector<8x8x16xf32> to vector<8x8x16xbf16>
    %c0_5 = arith.constant 0 : index
    %c0_6 = arith.constant 0 : index
    %4 = vector.load %arg4[%c0_5, %c0_6] : memref<16x128xbf16, #tpu.memory_space<vmem>>, vector<16x128xbf16>
    "tpu.trace_start"() <{level = 10 : i32, message = "gni,id->gnd"}> : () -> ()
    %cst_7 = arith.constant dense<0.000000e+00> : vector<8x8x128xf32>
    %5 = tpu.matmul %3, %4, %cst_7 {dimension_numbers = #tpu.dot_dimension_numbers<[2], [0], [0, 1], [1], [0, 0, 0, 1, 1, 1], [], []>} : vector<8x8x16xbf16>, vector<16x128xbf16>, vector<8x8x128xf32> -> vector<8x8x128xf32>
    "tpu.trace_stop"() : () -> ()
    %6 = arith.extf %0 : vector<8x8x8xbf16> to vector<8x8x8xf32>
    %cst_8 = arith.constant dense<0.000000e+00> : vector<8x8xf32>
    %7 = vector.multi_reduction <add>, %6, %cst_8 [2] : vector<8x8x8xf32> to vector<8x8xf32>
    %8 = vector.shape_cast %7 : vector<8x8xf32> to vector<8x8x1xf32>
    %c0_9 = arith.constant 0 : index
    %c0_10 = arith.constant 0 : index
    %9 = vector.load %arg5[%c0_9, %c0_10] : memref<1x128xf32, #tpu.memory_space<vmem>>, vector<1x128xf32>
    %10 = vector.shape_cast %9 : vector<1x128xf32> to vector<1x1x128xf32>
    %11 = vector.broadcast %8 : vector<8x8x1xf32> to vector<8x8x128xf32>
    %12 = vector.broadcast %10 : vector<1x1x128xf32> to vector<8x8x128xf32>
    %13 = arith.mulf %11, %12 : vector<8x8x128xf32>
    %14 = arith.addf %5, %13 : vector<8x8x128xf32>
    %c0_11 = arith.constant 0 : index
    %15 = memref.load %arg1[%c0_11] : memref<1xf32, #tpu.memory_space<smem>>
    %cst_12 = arith.constant 0.000000e+00 : f32
    %16 = vector.broadcast %cst_12 : f32 to vector<8x8x128xf32>
    %17 = arith.cmpf ogt, %14, %16 : vector<8x8x128xf32>
    %18 = vector.broadcast %15 : f32 to vector<8x8x128xf32>
    %19 = arith.mulf %18, %14 : vector<8x8x128xf32>
    %20 = arith.select %17, %14, %19 : vector<8x8x128xi1>, vector<8x8x128xf32>
    %c0_13 = arith.constant 0 : index
    %c0_14 = arith.constant 0 : index
    %c0_15 = arith.constant 0 : index
    %21 = vector.load %arg6[%c0_13, %c0_14, %c0_15] : memref<8x8x1xf32, #tpu.memory_space<vmem>>, vector<8x8x1xf32>
    %22 = vector.broadcast %21 : vector<8x8x1xf32> to vector<8x8x128xf32>
    %23 = arith.mulf %22, %20 : vector<8x8x128xf32>
    %cst_16 = arith.constant dense<0.000000e+00> : vector<8x128xf32>
    %24 = vector.multi_reduction <add>, %23, %cst_16 [1] : vector<8x8x128xf32> to vector<8x128xf32>
    %c0_17 = arith.constant 0 : index
    %c0_18 = arith.constant 0 : index
    %25 = vector.load %arg7[%c0_17, %c0_18] : memref<8x128xf32, #tpu.memory_space<vmem>>, vector<8x128xf32>
    tpu.vector_store %arg7[%c0_17, %c0_18], %24 {strides = array<i32>} : memref<8x128xf32, #tpu.memory_space<vmem>>, vector<8x128xf32>,
    %cst_19 = arith.constant dense<0.000000e+00> : vector<8x128xf32>
    %26 = vector.multi_reduction <add>, %20, %cst_19 [1] : vector<8x8x128xf32> to vector<8x128xf32>
    %cst_20 = arith.constant 8.000000e+00 : f32
    %27 = vector.broadcast %cst_20 : f32 to vector<8x128xf32>
    %28 = arith.divf %26, %27 : vector<8x128xf32>
    %c0_21 = arith.constant 0 : index
    %c0_22 = arith.constant 0 : index
    %29 = vector.load %arg8[%c0_21, %c0_22] : memref<8x128xf32, #tpu.memory_space<vmem>>, vector<8x128xf32>
    tpu.vector_store %arg8[%c0_21, %c0_22], %28 {strides = array<i32>} : memref<8x128xf32, #tpu.memory_space<vmem>>, vector<8x128xf32>,
    return
  }
  func.func @transform_0(%arg0: i32) -> i32 {
    %c0_i32 = arith.constant 0 : i32
    %c0_i32_0 = arith.constant 0 : i32
    return %c0_i32 : i32
  }
  func.func @transform_1(%arg0: i32) -> (i32, i32, i32) {
    %c0_i32 = arith.constant 0 : i32
    %c0_i32_0 = arith.constant 0 : i32
    %c0_i32_1 = arith.constant 0 : i32
    return %arg0, %c0_i32, %c0_i32_0 : i32, i32, i32
  }
  func.func @transform_2(%arg0: i32) -> (i32, i32, i32) {
    %c0_i32 = arith.constant 0 : i32
    %c0_i32_0 = arith.constant 0 : i32
    %c0_i32_1 = arith.constant 0 : i32
    return %arg0, %c0_i32, %c0_i32_0 : i32, i32, i32
  }
  func.func @transform_3(%arg0: i32) -> (i32, i32) {
    %c0_i32 = arith.constant 0 : i32
    %c0_i32_0 = arith.constant 0 : i32
    %c0_i32_1 = arith.constant 0 : i32
    return %c0_i32, %c0_i32_0 : i32, i32
  }
  func.func @transform_4(%arg0: i32) -> (i32, i32) {
    %c0_i32 = arith.constant 0 : i32
    %c0_i32_0 = arith.constant 0 : i32
    %c0_i32_1 = arith.constant 0 : i32
    return %c0_i32, %c0_i32_0 : i32, i32
  }
  func.func @transform_5(%arg0: i32) -> (i32, i32, i32) {
    %c0_i32 = arith.constant 0 : i32
    %c0_i32_0 = arith.constant 0 : i32
    %c0_i32_1 = arith.constant 0 : i32
    return %arg0, %c0_i32, %c0_i32_0 : i32, i32, i32
  }
  func.func @transform_6(%arg0: i32) -> (i32, i32) {
    %c0_i32 = arith.constant 0 : i32
    %c0_i32_0 = arith.constant 0 : i32
    return %arg0, %c0_i32 : i32, i32
  }
  func.func @transform_7(%arg0: i32) -> (i32, i32) {
    %c0_i32 = arith.constant 0 : i32
    %c0_i32_0 = arith.constant 0 : i32
    return %arg0, %c0_i32 : i32, i32
  }
}

</mosaic_0001>

<bundles_post_ra>
// kernel: tpu_custom_call.1
= control target key start
LH: loop header
LB: loop body
LE: loop exit
PB: predicated region body
PF: predicated region fallthrough
CT: control target
= control target key end

     0   :  { %s1805_s0 = inlined_call_operand.<no memory space> [shape: f32[1], index: 0, kind: input, shape index: {}]   ;;  %s1806_s1 = inlined_call_operand.vmem [shape: bf16[16,8,8], index: 1, kind: input, shape index: {}]   ;;  %s1807_s2 = inlined_call_operand.vmem [shape: bf16[16,8,16], index: 2, kind: input, shape index: {}]   ;;  %s1808_s3 = inlined_call_operand.vmem [shape: bf16[16,128], index: 3, kind: input, shape index: {}]   ;;  %s1809_s4 = inlined_call_operand.vmem [shape: f32[1,128], index: 4, kind: input, shape index: {}]   ;;  %s1810_s5 = inlined_call_operand.vmem [shape: f32[16,8,1], index: 5, kind: input, shape index: {}]   ;;  %s1811_s6 = inlined_call_operand.hbm [shape: f32[16,128], index: 6, kind: output, shape index: {0}]   ;;  %s1812_s7 = inlined_call_operand.hbm [shape: f32[16,128], index: 7, kind: output, shape index: {1}]  }
   0x1   :  { %13 = sst [smem:[#allocation2]] %s1805_s0 }
   0x2   :  { %14 = vsyncpa [#allocation4], 0 }
   0x3   :  { %16 = vsyncpa [#allocation4 + $0x1], 0 }
   0x4   :  { %17 = vsyncpa [#allocation6], 0 }
   0x5   :  { %19 = vsyncpa [#allocation6 + $0x1], 0  ;;  %s1571_s26 = smov 0   ;;  %s1573_s27 = smov 0  }
   0x6   :  { %s1575_s28 = smov 0   ;;  %s1577_s29 = smov 0  }
   0x7 LB: > { %s1592_s0 = sadd.s32 4294967295, %s1521_s29   ;;  %s1258_s30 = sadd.s32 4294967294, %s1521_s29   ;;  %s1521_s29 = sphi %s1577_s29, %s1818_s29   ;;  %s1517_s28 = sphi %s1575_s28, %s1817_s28   ;;  %s1513_s27 = sphi %s1573_s27, %s1816_s27   ;;  %s1509_s26 = sphi %s1571_s26, %s1815_s26  }
   0x8   : > { %s1596_s8 = sadd.s32 1, %s1521_s29   ;;  %s173_s9 = sadd.s32 1, %s1517_s28 }
   0x9   : > { %s170_s10 = ssub.s32 %s1521_s29, %s1596_s8  ;;  %p183_p0 = scmp.ne.s32.totalorder %s1517_s28, %s1513_s27 }
   0xa   : > { %p171_p1 = scmp.eq.s32.totalorder %s170_s10, 0  ;;  %p184_p2 = scmp.eq.s32.totalorder %s1592_s0, 1 }
   0xb   : > { %p189_p3 = scmp.ne.s32.totalorder %s1513_s27, %s1509_s26  ;;  %p190_p4 = scmp.eq.s32.totalorder %s1258_s30, 1 }
   0xc   : > { %s1607_s11 = scalar_select %p171_p1, %s1517_s28, %s173_s9  }
   0xd   : > { %p1609_p5 = por %p184_p2, %p183_p0  ;;  %p1613_p6 = por %p190_p4, %p189_p3 }
   0xe   : > { %p1261_p7 = scmp.ge.s32.totalorder %s1521_s29, 1  ;;  %p270_p8 = scmp.lt.s32.totalorder %s1521_s29, 3 }
  0x10   : > { %p271_p9 = pnand %p1261_p7, %p270_p8 }
  0x11   : > { %s1264_s14 = sshll.u32 (!%p271_p9), %s1592_s0, 3  ;;  %v1523_v0 = vmov (!%p271_p9), 0.0   ;;  %vm1524_vm0 = vmmov (!%p271_p9), 0   ;;  %vm356_vm1 = vcmask (!%p271_p9), 1043456   ;;  %vm352_vm2 = vcmask (!%p271_p9), 64512   ;;  %v1426_v25 = vld [vmem:[%s1808_s3] sm:$0xff] (!%p271_p9)  }
  0x12   : > { %274 = sbr.rel (%p271_p9) target bundleno = 560 (0x230), region = 44  ;;  %1319 = vmatprep.subr.bf16.mxu1 (!%p271_p9), %v1523_v0  ;;  %p318_p10 = scmp.lt.s32.totalorder (!%p271_p9), %s1264_s14, 15  ;;  %1321 = vmatprep.mubr.msk.bf16.mxu1 (!%p271_p9), %vm1524_vm0, %v1523_v0  ;;  %v1525_v31 = vmov (!%p271_p9), 0   ;;  %vm805_vm3 = vcmask (!%p271_p9), 130048   ;;  %vm1021_vm8 = vcmask (!%p271_p9), 1041409   ;;  %vm1023_vm9 = vcmask (!%p271_p9), 1042434  }
  0x13   : > { %1331 = vmatprep.subr.bf16.mxu0 (!%p271_p9), %v1523_v0  ;;  %1333 = vmatprep.mubr.msk.bf16.mxu0 (!%p271_p9), %vm1524_vm0, %v1523_v0  ;;  %s883_s10 = sld [smem:[#allocation2]] (!%p271_p9)  ;;  %vm1025_vm10 = vcmask (!%p271_p9), 1043459   ;;  %s1724_s16 = sand.u32 (!%p271_p9), 1, %s1513_s27   ;;  %vm1027_vm15 = vcmask (!%p271_p9), 1044484  }
  0x14   : > { %1425 = vset.pattern.permute.xlu1 (!%p271_p9), %v1525_v31  ;;  %1424 = vset.pattern.permute.xlu0 (!%p271_p9), %v1525_v31  ;;  %v1278_v31 = vld [vmem:[%s1809_s4] ss:$0 sm:$0xff] (!%p271_p9)  ;;  %s1262_s17 = sshll.u32 (!%p271_p9), %s1724_s16, 3 }
  0x15   : > { %s309_s19 = scalar_lea.vmem (!%p271_p9), [#allocation3], %s1262_s17 }
  0x16   : > { %s1130_s20 = sshll.u32 (!%p271_p9), %s309_s19, 4  ;;  %s1735_s20 = int_to_ptr.vmem [resolvable:$true] %s1130_s20 }
  0x19   : > { %s1820_s14 = smov (!%p318_p10, %s1264_s14), 15 }
  0x1a   : > { %s1265_s15 = sshll.u32 %s1820_s14, 2  ;;  %s1269_s24 = sshll.u32 %s1820_s14, 3 }
  0x1b   : > { %s1628_s18 = scalar_lea.vmem %s1807_s2, %s1265_s15  ;;  %s1633_s21 = scalar_lea.vmem %s1806_s1, %s1265_s15 }
  0x1c   : > { %v344_v1 = vld [vmem:[%s1628_s18] sm:$0xf]  ;;  %v345_v2 = vld [vmem:[%s1628_s18 + $0x4] sm:$0xf]  ;;  %v346_v5 = vld [vmem:[%s1628_s18 + $0x8] sm:$0xf]  ;;  %s333_s9 = scalar_lea.vmem %s1810_s5, %s1269_s24 }
  0x1d   : > { %v358_v3 = vsel %vm356_vm1, %v344_v1, 0  ;;  %v336_v4 = vld [vmem:[%s1633_s21] sm:$0xf]  ;;  %v404_v6 = vsel %vm356_vm1, %v345_v2, 0  ;;  %v450_v7 = vsel %vm356_vm1, %v346_v5, 0  ;;  %v910_v43 = vld [vmem:[%s333_s9 + $0x8] sm:$0xff] }
  0x1e   : > { %1320 = vmatpush3.bf16.msra.mxu1 %v358_v3  ;;  %v348_v8 = vld [vmem:[%s1628_s18 + $0x10] sm:$0xf]  ;;  %1332 = vmatpush3.bf16.msra.mxu0 %v450_v7  ;;  %v338_v9 = vld [vmem:[%s1633_s21 + $0x8] sm:$0xf]  ;;  %v347_v11 = vld [vmem:[%s1628_s18 + $0xc] sm:$0xf]  ;;  %v732_v28 = vunpack.c.l.bf16 %v336_v4 }
  0x1f   : > { %1325 = vmatprep.subr.bf16.mxu1 %v1523_v0  ;;  %1343 = vmatprep.subr.bf16.mxu0 %v1523_v0  ;;  %v542_v10 = vsel %vm356_vm1, %v348_v8, 0  ;;  %v337_v12 = vld [vmem:[%s1633_s21 + $0x4] sm:$0xf]  ;;  %v350_v13 = vld [vmem:[%s1628_s18 + $0x18] sm:$0xf]  ;;  %v496_v14 = vsel %vm356_vm1, %v347_v11, 0  ;;  %v734_v26 = vunpack.c.l.bf16 %v338_v9 }
  0x20   : > { %v340_v15 = vld [vmem:[%s1633_s21 + $0x10] sm:$0xf]  ;;  %v634_v16 = vsel %vm356_vm1, %v350_v13, 0  ;;  %v349_v17 = vld [vmem:[%s1628_s18 + $0x14] sm:$0xf]  ;;  %v733_v29 = vunpack.c.l.bf16 %v337_v12  ;;  %v740_v32 = vsel %vm352_vm2, %v732_v28, 0.0 }
  0x21   : > { %1322 = vmatmul.mubr.msk.bf16.vlgmr.msra.gmra.mrb[0].mxu1 %vm352_vm2, %v336_v4  ;;  %1334 = vmatmul.mubr.msk.bf16.vlgmr.msra.gmra.mrb[0].mxu0 %vm352_vm2, %v338_v9  ;;  %v339_v18 = vld [vmem:[%s1633_s21 + $0xc] sm:$0xf]  ;;  %v588_v19 = vsel %vm356_vm1, %v349_v17, 0  ;;  %v342_v20 = vld [vmem:[%s1633_s21 + $0x18] sm:$0xf]  ;;  %v746_v30 = vsel %vm352_vm2, %v734_v26, 0.0  ;;  %v736_v36 = vunpack.c.l.bf16 %v340_v15 }
  0x22   : > { %1326 = vmatpush3.bf16.msra.mxu1 %v404_v6  ;;  %1327 = vmatprep.mubr.msk.bf16.mxu1 %vm1524_vm0, %v1523_v0  ;;  %v351_v21 = vld [vmem:[%s1628_s18 + $0x1c] sm:$0xf]  ;;  %v341_v22 = vld [vmem:[%s1633_s21 + $0x14] sm:$0xf]  ;;  %v735_v27 = vunpack.c.l.bf16 %v339_v18  ;;  %v743_v35 = vsel %vm352_vm2, %v733_v29, 0.0  ;;  %v738_v40 = vunpack.c.l.bf16 %v342_v20  ;;  %v909_v45 = vld [vmem:[%s333_s9] sm:$0xff] }
  0x23   : > { %1337 = vmatprep.subr.bf16.mxu1 %v1523_v0  ;;  %1344 = vmatpush3.bf16.msra.mxu0 %v542_v10  ;;  %v680_v23 = vsel %vm356_vm1, %v351_v21, 0  ;;  %v343_v24 = vld [vmem:[%s1633_s21 + $0x1c] sm:$0xf]  ;;  %v737_v34 = vunpack.c.l.bf16 %v341_v22  ;;  %v752_v39 = vsel %vm352_vm2, %v736_v36, 0.0  ;;  %v911_v44 = vld [vmem:[%s333_s9 + $0x10] sm:$0xff]  ;;  %v913_v47 = vld [vmem:[%s333_s9 + $0x20] sm:$0xff] }
  0x24   : > { %1345 = vmatprep.mubr.msk.bf16.mxu0 %vm1524_vm0, %v1523_v0  ;;  %1355 = vmatprep.subr.bf16.mxu0 %v1523_v0  ;;  %v749_v33 = vsel %vm352_vm2, %v735_v27, 0.0  ;;  %v739_v38 = vunpack.c.l.bf16 %v343_v24  ;;  %v758_v42 = vsel %vm352_vm2, %v738_v40, 0.0  ;;  %v912_v46 = vld [vmem:[%s333_s9 + $0x18] sm:$0xff]  ;;  %v914_v48 = vld [vmem:[%s333_s9 + $0x28] sm:$0xff]  ;;  %v915_v49 = vld [vmem:[%s333_s9 + $0x30] sm:$0xff]  ;;  %s1290_s18 = sshll.u32 %s1592_s0, 7 }
  0x25   : > { %747 = vadd.xlane.f32.xlu1 %v746_v30  ;;  %741 = vadd.xlane.f32.xlu0 %v740_v32  ;;  %v755_v37 = vsel %vm352_vm2, %v737_v34, 0.0  ;;  %v916_v50 = vld [vmem:[%s333_s9 + $0x38] sm:$0xff]  ;;  %vm1031_vm1 = vcmask 1046534   ;;  %s316_s21 = scalar_lea.vmem [#allocation5], %s1262_s17  ;;  %s1732_s25 = scalar_lea.hbm %s1811_s6, %s1290_s18 }
  0x26   : > { %v761_v41 = vsel %vm352_vm2, %v739_v38, 0.0  ;;  %s1143_s22 = sshll.u32 %s316_s21, 4  ;;  %s1740_s9 = scalar_lea.hbm %s1812_s7, %s1290_s18  ;;  %s1742_s22 = int_to_ptr.vmem [resolvable:$true] %s1143_s22 }
  0x27   : > { %s1427_s14 = scalar_lea.vmem %s1735_s20, 128  ;;  %s1526_s15 = smov [#allocation3]  }
  0x28   : > { %p1428_p11 = scmp.ne.s32.totalorder %s1735_s20, %s1427_s14  ;;  %s1431_s17 = sshll.u32 %s1526_s15, 4  ;;  %s1432_s17 = int_to_ptr.vmem [resolvable:$false] %s1431_s17 }
  0x29   : > { %1328 = vmatmul.mubr.msk.bf16.vlgmr.msra.gmra.mrb[4].mxu1 %vm352_vm2, %v337_v12  ;;  %1346 = vmatmul.mubr.msk.bf16.vlgmr.msra.gmra.mrb[4].mxu0 %vm352_vm2, %v340_v15  ;;  %s1433_s23 = scalar_lea.vmem %s1432_s17, 256  ;;  %p1434_p0 = scmp.lt.s32.totalorder %s1735_s20, %s1432_s17 }
  0x2a   : > { %1338 = vmatpush3.bf16.msra.mxu1 %v496_v14  ;;  %1339 = vmatprep.mubr.msk.bf16.mxu1 %vm1524_vm0, %v1523_v0  ;;  %p1429_p12 = pnand %p1428_p11, %p1609_p5  ;;  %p1435_p1 = scmp.lt.s32.totalorder %s1433_s23, %s1427_s14 }
  0x2b   : > { %1349 = vmatprep.subr.bf16.mxu1 %v1523_v0  ;;  %1356 = vmatpush3.bf16.msra.mxu0 %v634_v16 }
  0x2c   : > { %1357 = vmatprep.mubr.msk.bf16.mxu0 %vm1524_vm0, %v1523_v0  ;;  %1367 = vmatprep.subr.bf16.mxu0 %v1426_v25  ;;  %p1430_p13 = pneg %p1429_p12  ;;  %p1436_p2 = por %p1435_p1, %p1434_p0 }
  0x2d   : > { %750 = vadd.xlane.f32.xlu1 %v749_v33  ;;  %744 = vadd.xlane.f32.xlu0 %v743_v35 }
  0x2e   : > { %p1437_p3 = pnand %p1436_p2, %p1430_p13 }
  0x31   : > { %1340 = vmatmul.mubr.msk.bf16.vlgmr.msra.gmra.mrb[8].mxu1 %vm352_vm2, %v339_v18  ;;  %1358 = vmatmul.mubr.msk.bf16.vlgmr.msra.gmra.mrb[8].mxu0 %vm352_vm2, %v342_v20 }
  0x32   : > { %1350 = vmatpush3.bf16.msra.mxu1 %v588_v19  ;;  %1351 = vmatprep.mubr.msk.bf16.mxu1 %vm1524_vm0, %v1523_v0 }
  0x33   : > { %1361 = vmatprep.subr.bf16.mxu1 %v1523_v0  ;;  %1368 = vmatpush3.bf16.msra.mxu0 %v1426_v25 }
  0x34   : > { %756 = vadd.xlane.f32.xlu1 %v755_v37  ;;  %753 = vadd.xlane.f32.xlu0 %v752_v39  ;;  %v1695_v37 = vstv %s883_s10  ;;  %s1112_s10 = scalar_lea.sflag [#allocation4], %s1724_s16 }
  0x38   : > { %762 = vadd.xlane.f32.xlu1 %v761_v41  ;;  %759 = vadd.xlane.f32.xlu0 %v758_v42 }
  0x39   : > { %1352 = vmatmul.mubr.msk.bf16.vlgmr.msra.gmra.mrb[12].mxu1 %vm352_vm2, %v341_v22 }
  0x3a   : > { %1362 = vmatpush3.bf16.msra.mxu1 %v680_v23  ;;  %1363 = vmatprep.mubr.msk.bf16.mxu1 %vm1524_vm0, %v1523_v0  ;;  %vm1029_vm0 = vcmask 1045509  }
  0x41   : > { %1364 = vmatmul.mubr.msk.bf16.vlgmr.msra.gmra.mrb[16].mxu1 %vm352_vm2, %v343_v24  ;;  %vm1033_vm2 = vcmask 1047559  }
  0x49   : > { %924 = vperm.xlu1 %1425, %v910_v43  }
  0x4d   : > { %929 = vperm.xlu1 %1425, %v911_v44  }
  0x4e   : > { %919 = vperm.xlu0 %1424, %v909_v45  }
  0x51   : > { %934 = vperm.xlu1 %1425, %v912_v46  }
  0x55   : > { %939 = vperm.xlu1 %1425, %v913_v47  }
  0x59   : > { %944 = vperm.xlu1 %1425, %v914_v48  }
  0x5d   : > { %949 = vperm.xlu1 %1425, %v915_v49  }
  0x61   : > { %954 = vperm.xlu1 %1425, %v916_v50  }
  0xb2   : > { %v748_v23 = vpop.xlane.xlu1 %747  ;;  %v742_v26 = vpop.xlane.xlu0 %741 }
  0xb3   : > { %v771_v32 = vmul.f32 %v1278_v31, %v742_v26  ;;  %v773_v33 = vmul.f32 %v1278_v31, %v748_v23 }
  0xba   : > { %v751_v24 = vpop.xlane.xlu1 %750  ;;  %v745_v28 = vpop.xlane.xlu0 %744 }
  0xbb   : > { %v772_v35 = vmul.f32 %v1278_v31, %v745_v28  ;;  %v774_v39 = vmul.f32 %v1278_v31, %v751_v24 }
  0xc1   : > { %v757_v25 = vpop.xlane.xlu1 %756  ;;  %v754_v30 = vpop.xlane.xlu0 %753 }
  0xc2   : > { %v1699_v49 = vmul.f32 %v1278_v31, %v757_v25 }
  0xc5   : > { %v763_v27 = vpop.xlane.xlu1 %762  ;;  %v760_v38 = vpop.xlane.xlu0 %759 }
  0xc9   : > { %v925_v29 = vpop.permute.xlu1 %924 }
  0xcd   : > { %v930_v34 = vpop.permute.xlu1 %929 }
  0xd1   : > { %v935_v50 = vpop.permute.xlu1 %934 }
  0xf4   : > { %v394_v51 = vpop.f32.mrb[0].mxu1  ;;  %v486_v54 = vpop.f32.mrb[0].mxu0 }
  0xf5   : > { %v1323_v52 = vpop.f32.mrb[1].mxu1  ;;  %v1335_v56 = vpop.f32.mrb[1].mxu0 }
  0xf6   : > { %v397_v53 = vpop.f32.mrb[2].mxu1  ;;  %v489_v57 = vpop.f32.mrb[2].mxu0 }
  0xf7   : > { %v1324_v55 = vpop.f32.mrb[3].mxu1  ;;  %v1336_v58 = vpop.f32.mrb[3].mxu0  ;;  %v1703_v57 = vmul.f32 %v1278_v31, %v763_v27 }
  0xf8   : > { %v920_v56 = vpop.permute.xlu0 %919  ;;  %v775_v58 = vmul.f32 %v1278_v31, %v754_v30 }
  0xfc   : > { %v440_v59 = vpop.f32.mrb[4].mxu1  ;;  %v578_v63 = vpop.f32.mrb[4].mxu0 }
  0xfd   : > { %v1294_v60 = vpack.c.bf16 %v440_v59, %v394_v51  ;;  %v1329_v61 = vpop.f32.mrb[5].mxu1  ;;  %v1347_v1 = vpop.f32.mrb[5].mxu0 }
  0xfe   : > { %v443_v62 = vpop.f32.mrb[6].mxu1  ;;  %v581_v2 = vpop.f32.mrb[6].mxu0  ;;  %v777_v1 = vmul.f32 %v1278_v31, %v760_v38 }
  0xff   : > { %v1330_v0 = vpop.f32.mrb[7].mxu1  ;;  %1369 = vmatprep.mubr.msk.bf16.mxu0 %vm805_vm3, %v1294_v60  ;;  %v1348_v3 = vpop.f32.mrb[7].mxu0 }
 0x104   : > { %v532_v4 = vpop.f32.mrb[8].mxu1  ;;  %v670_v8 = vpop.f32.mrb[8].mxu0 }
 0x105   : > { %v1295_v5 = vpack.c.bf16 %v532_v4, %v486_v54  ;;  %v1341_v6 = vpop.f32.mrb[9].mxu1  ;;  %v1359_v10 = vpop.f32.mrb[9].mxu0 }
 0x106   : > { %v535_v7 = vpop.f32.mrb[10].mxu1  ;;  %v673_v11 = vpop.f32.mrb[10].mxu0 }
 0x107   : > { %v1342_v9 = vpop.f32.mrb[11].mxu1  ;;  %1370 = vmatmul.mubr.msk.bf16.vlgmr.msra.gmra.mrb[12].mxu0 %vm805_vm3, %v1295_v5  ;;  %v1360_v12 = vpop.f32.mrb[11].mxu0 }
 0x108   : > { %v1705_v9 = vpop.permute.xlu1 %939 }
 0x10c   : > { %v624_v13 = vpop.f32.mrb[12].mxu1 }
 0x10d   : > { %v1296_v14 = vpack.c.bf16 %v624_v13, %v578_v63  ;;  %v1353_v15 = vpop.f32.mrb[13].mxu1 }
 0x10e   : > { %v627_v16 = vpop.f32.mrb[14].mxu1 }
 0x10f   : > { %v1354_v17 = vpop.f32.mrb[15].mxu1  ;;  %1373 = vmatprep.mubr.msk.bf16.mxu0 %vm805_vm3, %v1296_v14 }
 0x114   : > { %v716_v18 = vpop.f32.mrb[16].mxu1 }
 0x115   : > { %v1297_v19 = vpack.c.bf16 %v716_v18, %v670_v8  ;;  %v1365_v20 = vpop.f32.mrb[17].mxu1 }
 0x116   : > { %v719_v21 = vpop.f32.mrb[18].mxu1 }
 0x117   : > { %v1366_v22 = vpop.f32.mrb[19].mxu1  ;;  %1374 = vmatmul.mubr.msk.bf16.gmra.mrb[16].mxu0 %vm805_vm3, %v1297_v19 }
 0x1da   : > { %v1371_v36 = vpop.f32.mrb[12].mxu0 }
 0x1db   : > { %v861_v40 = vadd.f32 %v1371_v36, %v773_v33  ;;  %v852_v41 = vpop.f32.mrb[13].mxu0 }
 0x1dc   : > { %v853_v42 = vadd.f32 %v852_v41, %v771_v32  ;;  %v1372_v43 = vpop.f32.mrb[14].mxu0 }
 0x1dd   : > { %vm886_vm4 = vcmp.gt.f32.partialorder %v861_v40, 0.0  ;;  %v895_v44 = vmul.f32 %v1695_v37, %v861_v40  ;;  %v864_v45 = vadd.f32 %v1372_v43, %v774_v39  ;;  %v855_v46 = vpop.f32.mrb[15].mxu0 }
 0x1de   : > { %v893_v47 = vmul.f32 %v1695_v37, %v853_v42  ;;  %v856_v48 = vadd.f32 %v855_v46, %v772_v35  ;;  %vm884_vm5 = vcmp.gt.f32.partialorder %v853_v42, 0.0  ;;  %v1707_v35 = vpop.permute.xlu1 %944 }
 0x1df   : > { %v903_v51 = vsel %vm886_vm4, %v861_v40, %v895_v44  ;;  %vm887_vm6 = vcmp.gt.f32.partialorder %v864_v45, 0.0  ;;  %v896_v52 = vmul.f32 %v1695_v37, %v864_v45 }
 0x1e0   : > { %v959_v53 = vmul.f32 %v930_v34, %v903_v51  ;;  %v1049_v54 = vrot.slane %v903_v51, 4  ;;  %vm885_vm7 = vcmp.gt.f32.partialorder %v856_v48, 0.0  ;;  %v894_v55 = vmul.f32 %v1695_v37, %v856_v48 }
 0x1e1   : > { %v904_v59 = vsel %vm887_vm6, %v864_v45, %v896_v52  ;;  %v901_v60 = vsel %vm884_vm5, %v853_v42, %v893_v47 }
 0x1e2   : > { %v977_v61 = vrot.slane %v959_v53, 4  ;;  %v1050_v62 = vadd.f32 %v1049_v54, %v903_v51  ;;  %v960_v63 = vmul.f32 %v935_v50, %v904_v59  ;;  %v1055_v0 = vrot.slane %v904_v59, 4 }
 0x1e3   : > { %v902_v2 = vsel %vm885_vm7, %v856_v48, %v894_v55  ;;  %v957_v3 = vmul.f32 %v920_v56, %v901_v60  ;;  %v1037_v4 = vrot.slane %v901_v60, 4 }
 0x1e4   : > { %v978_v5 = vadd.f32 %v977_v61, %v959_v53  ;;  %v1051_v6 = vrot.slane %v1050_v62, 2  ;;  %v983_v7 = vrot.slane %v960_v63, 4  ;;  %v1056_v8 = vadd.f32 %v1055_v0, %v904_v59 }
 0x1e5   : > { %v958_v10 = vmul.f32 %v925_v29, %v902_v2  ;;  %v1043_v11 = vrot.slane %v902_v2, 4  ;;  %v965_v12 = vrot.slane %v957_v3, 4  ;;  %v1038_v13 = vadd.f32 %v1037_v4, %v901_v60 }
 0x1e6   : > { %v979_v14 = vrot.slane %v978_v5, 2  ;;  %v1052_v15 = vadd.f32 %v1051_v6, %v1050_v62  ;;  %v984_v16 = vadd.f32 %v983_v7, %v960_v63  ;;  %v1057_v17 = vrot.slane %v1056_v8, 2  ;;  %v950_v63 = vpop.permute.xlu1 %949 }
 0x1e7   : > { %v971_v18 = vrot.slane %v958_v10, 4  ;;  %v1044_v19 = vadd.f32 %v1043_v11, %v902_v2  ;;  %v966_v20 = vadd.f32 %v965_v12, %v957_v3  ;;  %v1039_v21 = vrot.slane %v1038_v13, 2 }
 0x1e8   : > { %v980_v22 = vadd.f32 %v979_v14, %v978_v5  ;;  %v1053_v23 = vrot.slane %v1052_v15, 1  ;;  %v985_v24 = vrot.slane %v984_v16, 2  ;;  %v1058_v25 = vadd.f32 %v1057_v17, %v1056_v8 }
 0x1e9   : > { %v972_v26 = vadd.f32 %v971_v18, %v958_v10  ;;  %v1045_v27 = vrot.slane %v1044_v19, 2  ;;  %v967_v28 = vrot.slane %v966_v20, 2  ;;  %v1040_v29 = vadd.f32 %v1039_v21, %v1038_v13 }
 0x1ea   : > { %v981_v30 = vrot.slane %v980_v22, 1  ;;  %v1054_v31 = vadd.f32 %v1053_v23, %v1052_v15  ;;  %v986_v32 = vadd.f32 %v985_v24, %v984_v16  ;;  %v1059_v33 = vrot.slane %v1058_v25, 1  ;;  %v1375_v34 = vpop.f32.mrb[16].mxu0 }
 0x1eb   : > { %v973_v36 = vrot.slane %v972_v26, 2  ;;  %v1046_v38 = vadd.f32 %v1045_v27, %v1044_v19  ;;  %v968_v39 = vadd.f32 %v967_v28, %v966_v20  ;;  %v1041_v40 = vrot.slane %v1040_v29, 1  ;;  %v868_v41 = vpop.f32.mrb[17].mxu0  ;;  %v955_v20 = vpop.permute.xlu1 %954 }
 0x1ec   : > { %v982_v42 = vadd.f32 %v981_v30, %v980_v22  ;;  %v1088_v43 = vmul.f32 0.125, %v1054_v31  ;;  %v1376_v44 = vpop.f32.mrb[18].mxu0  ;;  %v987_v51 = vrot.slane %v986_v32, 1  ;;  %v1060_v52 = vadd.f32 %v1059_v33, %v1058_v25 }
 0x1ed   : > { %v974_v45 = vadd.f32 %v973_v36, %v972_v26  ;;  %v1047_v46 = vrot.slane %v1046_v38, 1  ;;  %v969_v47 = vrot.slane %v968_v39, 1  ;;  %v1042_v48 = vadd.f32 %v1041_v40, %v1040_v29  ;;  %v871_v50 = vpop.f32.mrb[19].mxu0 }
 0x1ee   : > { %v877_v53 = vadd.f32 %v1375_v34, %v777_v1  ;;  %v869_v54 = vadd.f32 %v868_v41, %v775_v58  ;;  %v880_v3 = vadd.f32 %v1376_v44, %v1703_v57  ;;  %v872_v4 = vadd.f32 %v871_v50, %v1699_v49 }
 0x1ef   : > { %v975_v55 = vrot.slane %v974_v45, 1  ;;  %v1048_v56 = vadd.f32 %v1047_v46, %v1046_v38  ;;  %v970_v59 = vadd.f32 %v969_v47, %v968_v39  ;;  %v1086_v60 = vmul.f32 0.125, %v1042_v48 }
 0x1f0   : > { %vm890_vm11 = vcmp.gt.f32.partialorder %v877_v53, 0.0  ;;  %v899_v61 = vmul.f32 %v1695_v37, %v877_v53  ;;  %vm888_vm12 = vcmp.gt.f32.partialorder %v869_v54, 0.0  ;;  %v897_v62 = vmul.f32 %v1695_v37, %v869_v54 }
 0x1f1   : > { %v976_v0 = vadd.f32 %v975_v55, %v974_v45  ;;  %v1087_v2 = vmul.f32 0.125, %v1048_v56  ;;  %v988_v5 = vadd.f32 %v987_v51, %v986_v32  ;;  %v1089_v1 = vmul.f32 0.125, %v1060_v52 }
 0x1f2   : > { %v907_v58 = vsel %vm890_vm11, %v877_v53, %v899_v61  ;;  %v905_v6 = vsel %vm888_vm12, %v869_v54, %v897_v62  ;;  %vm891_vm13 = vcmp.gt.f32.partialorder %v880_v3, 0.0  ;;  %v900_v49 = vmul.f32 %v1695_v37, %v880_v3 }
 0x1f3   : > { %v1022_v7 = vsel %vm1021_vm8, %v976_v0, %v970_v59  ;;  %v1102_v8 = vsel %vm1021_vm8, %v1087_v2, %v1086_v60  ;;  %v963_v10 = vmul.f32 %v950_v63, %v907_v58  ;;  %v1073_v11 = vrot.slane %v907_v58, 4 }
 0x1f4   : > { %v1024_v12 = vsel %vm1023_vm9, %v982_v42, %v1022_v7  ;;  %v961_v13 = vmul.f32 %v1705_v9, %v905_v6  ;;  %v1061_v14 = vrot.slane %v905_v6, 4  ;;  %vm889_vm14 = vcmp.gt.f32.partialorder %v872_v4, 0.0 }
 0x1f5   : > { %v1001_v15 = vrot.slane %v963_v10, 4  ;;  %v1074_v57 = vadd.f32 %v1073_v11, %v907_v58  ;;  %v898_v18 = vmul.f32 %v1695_v37, %v872_v4  ;;  %v1026_v19 = vsel %vm1025_vm10, %v988_v5, %v1024_v12 }
 0x1f6   : > { %v989_v16 = vrot.slane %v961_v13, 4  ;;  %v1062_v17 = vadd.f32 %v1061_v14, %v905_v6  ;;  %v908_v23 = vsel %vm891_vm13, %v880_v3, %v900_v49  ;;  %v1103_v24 = vsel %vm1023_vm9, %v1088_v43, %v1102_v8 }
 0x1f7   : > { %v1002_v21 = vadd.f32 %v1001_v15, %v963_v10  ;;  %v1075_v22 = vrot.slane %v1074_v57, 2  ;;  %v964_v26 = vmul.f32 %v955_v20, %v908_v23  ;;  %v1079_v27 = vrot.slane %v908_v23, 4 }
 0x1f8   : > { %v990_v9 = vadd.f32 %v989_v16, %v961_v13  ;;  %v1063_v25 = vrot.slane %v1062_v17, 2  ;;  %v906_v28 = vsel %vm889_vm14, %v872_v4, %v898_v18  ;;  %v1104_v29 = vsel %vm1025_vm10, %v1089_v1, %v1103_v24 }
 0x1f9   : > { %v1007_v32 = vrot.slane %v964_v26, 4  ;;  %v1080_v37 = vadd.f32 %v1079_v27, %v908_v23  ;;  %v1003_v33 = vrot.slane %v1002_v21, 2  ;;  %v1076_v34 = vadd.f32 %v1075_v22, %v1074_v57 }
 0x1fa   : > { %v991_v30 = vrot.slane %v990_v9, 2  ;;  %v1064_v31 = vadd.f32 %v1063_v25, %v1062_v17  ;;  %v962_v36 = vmul.f32 %v1707_v35, %v906_v28  ;;  %v1067_v38 = vrot.slane %v906_v28, 4 }
 0x1fb   : > { %v1008_v41 = vadd.f32 %v1007_v32, %v964_v26  ;;  %v1081_v42 = vrot.slane %v1080_v37, 2  ;;  %v1004_v52 = vadd.f32 %v1003_v33, %v1002_v21  ;;  %v1077_v53 = vrot.slane %v1076_v34, 1 }
 0x1fc   : > { %v992_v39 = vadd.f32 %v991_v30, %v990_v9  ;;  %v1065_v40 = vrot.slane %v1064_v31, 1  ;;  %v995_v43 = vrot.slane %v962_v36, 4  ;;  %v1068_v44 = vadd.f32 %v1067_v38, %v906_v28 }
 0x1fd   : > { %v1009_v47 = vrot.slane %v1008_v41, 2  ;;  %v1082_v48 = vadd.f32 %v1081_v42, %v1080_v37  ;;  %v1078_v2 = vadd.f32 %v1077_v53, %v1076_v34  ;;  %v1005_v3 = vrot.slane %v1004_v52, 1 }
 0x1fe   : > { %v993_v45 = vrot.slane %v992_v39, 1  ;;  %v1066_v46 = vadd.f32 %v1065_v40, %v1064_v31  ;;  %v996_v50 = vadd.f32 %v995_v43, %v962_v36  ;;  %v1069_v51 = vrot.slane %v1068_v44, 2 }
 0x1ff   : > { %v1083_v55 = vrot.slane %v1082_v48, 1  ;;  %v1010_v60 = vadd.f32 %v1009_v47, %v1008_v41  ;;  %v1006_v8 = vadd.f32 %v1005_v3, %v1004_v52  ;;  %v1092_v10 = vmul.f32 0.125, %v1078_v2 }
 0x200   : > { %v994_v35 = vadd.f32 %v993_v45, %v992_v39  ;;  %v1090_v54 = vmul.f32 0.125, %v1066_v46  ;;  %v997_v56 = vrot.slane %v996_v50, 2  ;;  %v1070_v59 = vadd.f32 %v1069_v51, %v1068_v44 }
 0x201   : > { %v1011_v1 = vrot.slane %v1010_v60, 1  ;;  %v1084_v58 = vadd.f32 %v1083_v55, %v1082_v48 }
 0x202   : > { %v1028_v61 = vsel %vm1027_vm15, %v994_v35, %v1026_v19  ;;  %v1105_v62 = vsel %vm1027_vm15, %v1090_v54, %v1104_v29  ;;  %v998_v63 = vadd.f32 %v997_v56, %v996_v50  ;;  %v1071_v0 = vrot.slane %v1070_v59, 1 }
 0x203   : > { %v1012_v11 = vadd.f32 %v1011_v1, %v1010_v60  ;;  %v1093_v13 = vmul.f32 0.125, %v1084_v58 }
 0x204   : > { %v999_v4 = vrot.slane %v998_v63, 1  ;;  %v1072_v5 = vadd.f32 %v1071_v0, %v1070_v59 }
 0x206   : > { %v1000_v6 = vadd.f32 %v999_v4, %v998_v63  ;;  %v1091_v7 = vmul.f32 0.125, %v1072_v5 }
 0x208   : > { %v1030_v12 = vsel %vm1029_vm0, %v1000_v6, %v1028_v61  ;;  %v1106_v14 = vsel %vm1029_vm0, %v1091_v7, %v1105_v62 }
 0x209   : > { %v1032_v15 = vsel %vm1031_vm1, %v1006_v8, %v1030_v12  ;;  %v1107_v57 = vsel %vm1031_vm1, %v1092_v10, %v1106_v14 }
 0x20a   : > { %v1034_v49 = vsel %vm1033_vm2, %v1012_v11, %v1032_v15  ;;  %v1108_v16 = vsel %vm1033_vm2, %v1093_v13, %v1107_v57 }
 0x20b   : > { %1036 = vst [vmem:[%s309_s19] sm:$0xff] %v1034_v49  ;;  %1110 = vst [vmem:[%s316_s21] sm:$0xff] %v1108_v16 }
 0x20c   : > { %1440 = shalt.err (!%p1437_p3)
}
 0x20d   : > { %s1441_s18 = scalar_lea.hbm %s1732_s25, 128  ;;  %s1445_s24 = scalar_lea.hbm %s1811_s6, 256 }
 0x20e   : > { %p1442_p4 = scmp.ne.s32.totalorder %s1732_s25, %s1441_s18  ;;  %p1446_p9 = scmp.lt.u32.totalorder %s1732_s25, %s1811_s6 }
 0x20f   : > { %p1447_p10 = scmp.lt.u32.totalorder %s1445_s24, %s1441_s18  ;;  %p1449_p12 = scmp.lt.u32.totalorder %s1441_s18, %s1732_s25 }
 0x210   : > { %p1443_p7 = pnand %p1442_p4, %p1609_p5 }
 0x211   : > { %p1448_p11 = por %p1447_p10, %p1446_p9 }
 0x212   : > { %p1444_p8 = pneg %p1443_p7 }
 0x213   : > { %p1450_p13 = por %p1449_p12, %p1448_p11 }
 0x215   : > { %p1451_p0 = pnand %p1450_p13, %p1444_p8 }
 0x217   : > { %1454 = shalt.err (!%p1451_p0)
}
 0x218   : > { %1377 = dma.vmem_to_hbm [thread:$0]  (%p1609_p5), %s1735_s20, 128, %s1732_s25, %s1112_s10  }
 0x219   : > { %s1117_s14 = scalar_lea.sflag [#allocation6], %s1724_s16  ;;  %s1455_s15 = scalar_lea.vmem %s1742_s22, 128 }
 0x21a   : > { %p1456_p1 = scmp.ne.s32.totalorder %s1742_s22, %s1455_s15  ;;  %s1527_s17 = smov [#allocation5]  }
 0x21b   : > { %s1459_s23 = sshll.u32 %s1527_s17, 4  ;;  %s1460_s23 = int_to_ptr.vmem [resolvable:$false] %s1459_s23 }
 0x21c   : > { %p1457_p2 = pnand %p1456_p1, %p1609_p5  ;;  %s1461_s18 = scalar_lea.vmem %s1460_s23, 256 }
 0x21d   : > { %p1462_p4 = scmp.lt.s32.totalorder %s1742_s22, %s1460_s23  ;;  %p1463_p7 = scmp.lt.s32.totalorder %s1461_s18, %s1455_s15 }
 0x21e   : > { %p1458_p3 = pneg %p1457_p2 }
 0x21f   : > { %p1464_p8 = por %p1463_p7, %p1462_p4 }
 0x221   : > { %p1465_p9 = pnand %p1464_p8, %p1458_p3 }
 0x223   : > { %1468 = shalt.err (!%p1465_p9)
}
 0x224   : > { %s1469_s16 = scalar_lea.hbm %s1740_s9, 128  ;;  %s1473_s10 = scalar_lea.hbm %s1812_s7, 256 }
 0x225   : > { %p1470_p10 = scmp.ne.s32.totalorder %s1740_s9, %s1469_s16  ;;  %p1474_p13 = scmp.lt.u32.totalorder %s1740_s9, %s1812_s7 }
 0x226   : > { %p1475_p0 = scmp.lt.u32.totalorder %s1473_s10, %s1469_s16  ;;  %p1477_p2 = scmp.lt.u32.totalorder %s1469_s16, %s1740_s9 }
 0x227   : > { %p1471_p11 = pnand %p1470_p10, %p1609_p5 }
 0x228   : > { %p1476_p1 = por %p1475_p0, %p1474_p13 }
 0x229   : > { %p1472_p12 = pneg %p1471_p11 }
 0x22a   : > { %p1478_p3 = por %p1477_p2, %p1476_p1 }
 0x22c   : > { %p1479_p4 = pnand %p1478_p3, %p1472_p12 }
 0x22e   : > { %1482 = shalt.err (!%p1479_p4)
}
 0x22f   : > { %1378 = dma.vmem_to_hbm [thread:$0]  (%p1609_p5), %s1742_s22, 128, %s1740_s9, %s1117_s14  }
 0x230 PF: > { %p1388_p7 = scmp.ge.s32.totalorder %s1521_s29, 2  ;;  %s1155_s24 = sand.u32 1, %s1509_s26  }
 0x231   : > { %s1156_s0 = scalar_lea.sflag [#allocation4], %s1155_s24 }
 0x232   : > { %p1382_p8 = pnand %p1388_p7, %p1613_p6 }
 0x234   : > { %1500 = dma.done.wait (!%p1382_p8), %s1156_s0, 128  }
 0x235   : > { %1502 = vsyncadd (!%p1382_p8), %s1156_s0, 4294967168  ;;  %s1165_s30 = scalar_lea.sflag [#allocation6], %s1155_s24 }
 0x236   : > { %1504 = dma.done.wait (!%p1382_p8), %s1165_s30, 128  }
 0x237   : > { %1506 = vsyncadd (!%p1382_p8), %s1165_s30, 4294967168  ;;  %p22_p5 = scmp.ge.s32.totalorder %s1596_s8, 4   ;;  %s1815_s26 = smov %s1513_s27 }
 0x238   : > { %s1816_s27 = smov %s1517_s28  ;;  %s1817_s28 = smov %s1607_s11 }
 0x239   : > { %s1818_s29 = smov %s1596_s8  ;;  %24 = sbr.rel (!%p22_p5) target bundleno = 7 (0x7), region = 102 }
 0x240   :  { %1170 = vsyncpa [#allocation4], 1 }
 0x241   :  { %1172 = vsyncpa [#allocation4 + $0x1], 1 }
 0x242   :  { %1173 = vsyncpa [#allocation6], 1 }
 0x243   :  { %1175 = vsyncpa [#allocation6 + $0x1], 1 }

</bundles_post_ra>
